<compile_context>
chip_gen: v7x
topology: tpu7x:2x2x1
jax: 0.10.0
libtpu: 0.0.40
codegen_flags: <defaults>
</compile_context>

<pallas_src>
import jax
import jax.numpy as jnp
from jax.experimental import pallas as pl
from jax.experimental.pallas import tpu as pltpu


def _unified_attention_kernel(x_ref, w_ref, out_ref, scores_ref):
    """Fused softmax(weights, axis=-1) * x for one (tile_rows, in_channels) tile."""
    w = w_ref[...].astype(jnp.float32)

    # Numerically-stable softmax over the channel (last / lane) axis, f32 math.
    m = jnp.max(w, axis=-1, keepdims=True)
    e = jnp.exp(w - m)
    denom = jnp.sum(e, axis=-1, keepdims=True)
    scores = e / denom                       # exact reciprocal; still EUP, free here

    scores_ref[...] = scores.astype(scores_ref.dtype)
    x = x_ref[...].astype(jnp.float32)
    out_ref[...] = (scores * x).astype(out_ref.dtype)


def _sublane_multiple(*dtypes):
    """Sublane rounding requirement for the widest packing among dtypes."""
    m = 8
    for dt in dtypes:
        isz = jnp.dtype(dt).itemsize
        if isz == 2:
            m = max(m, 16)
        elif isz == 1:
            m = max(m, 32)
    return m


def _vmem_budget_bytes():
    """(per-TC VMEM budget for this kernel's buffers, likely_two_tensorcores)."""
    try:
        cap = int(pltpu.get_tpu_info().vmem_capacity_bytes)
    except Exception:
        cap = 64 << 20                     # conservative: assume v7x-sized VMEM
    if cap <= (64 << 20):
        # v7x: 64 MiB/TC -> keep double-buffering intact, leave headroom.
        return 44 << 20, True
    # v5e/v6e: 128 MiB physical; 64 MiB is past diminishing returns.
    return 64 << 20, False


def _choose_tiling(total_rows, in_channels, itemsizes, sublane, budget, two_cores):
    """Pick (tile_rows, n_steps). Biggest tile that fits VMEM / roofline knee."""
    # Per-row bytes: 4 HBM streams, each double-buffered, plus f32 temporaries.
    per_row = 2 * in_channels * sum(itemsizes) + 4 * in_channels * 4
    rows_by_vmem = max(sublane, (budget // per_row) // sublane * sublane)
    # ~4 MiB per (f32) stream sits past the measured HBM-roofline knee.
    rows_by_knee = max(sublane, ((4 << 20) // (in_channels * 4)) // sublane * sublane)
    cap_rows = min(rows_by_vmem, rows_by_knee)

    min_steps = 1
    # v7x: make the 'parallel' grid axis actually feed both TensorCores once the
    # problem is large enough for the split to pay for its per-step overhead.
    if two_cores and total_rows * in_channels * 4 >= (1 << 20) and total_rows >= 2 * sublane:
        min_steps = 2

    n_steps = max(min_steps, pl.cdiv(total_rows, cap_rows))
    if n_steps == 1:
        # Single full-array block: block dims equal array dims, so no (8,128)
        # divisibility requirement and zero per-step overhead beyond one.
        return total_rows, 1

    tile_rows = pl.cdiv(pl.cdiv(total_rows, n_steps), sublane) * sublane
    tile_rows = min(tile_rows, cap_rows)
    tile_rows = max(sublane, (tile_rows // sublane) * sublane)
    return tile_rows, pl.cdiv(total_rows, tile_rows)


def unified_attention_dynamic(x, attn_weights, *, tile_rows=None):
    """Pallas wrapper. x, attn_weights: [num_nodes, seq_len, in_channels]."""
    num_nodes, seq_len, in_channels = x.shape
    assert attn_weights.shape == x.shape

    scores_dtype = attn_weights.dtype
    out_dtype = jnp.result_type(x.dtype, attn_weights.dtype)

    total_rows = num_nodes * seq_len
    # Free views — no HBM copies.
    x2 = x.reshape(total_rows, in_channels)
    w2 = attn_weights.reshape(total_rows, in_channels)

    itemsizes = [jnp.dtype(d).itemsize
                 for d in (x.dtype, attn_weights.dtype, out_dtype, scores_dtype)]
    sublane = _sublane_multiple(x.dtype, attn_weights.dtype, out_dtype, scores_dtype)
    budget, two_cores = _vmem_budget_bytes()

    if tile_rows is None:
        tile_rows, n_steps = _choose_tiling(
            total_rows, in_channels, itemsizes, sublane, budget, two_cores)
    else:
        tile_rows = min(int(tile_rows), total_rows)
        if tile_rows != total_rows:
            tile_rows = max(sublane, (tile_rows // sublane) * sublane)
        n_steps = pl.cdiv(total_rows, tile_rows)

    # TODO(synk): if in_channels is far from a multiple of 128 and this kernel
    # becomes hot, pad the channel axis once (with -inf in the weights) to get
    # unmasked lane-dense stores; not done here to avoid extra HBM pad traffic.
    spec = pl.BlockSpec((tile_rows, in_channels), lambda i: (i, 0))

    # Explicit VMEM limit covering 4 streams x 2 buffers x tile + f32 temps,
    # capped per generation (<= ~48 MiB on v7x, <= ~68 MiB on v5e/v6e).
    needed = tile_rows * in_channels * (2 * sum(itemsizes) + 16)
    vmem_limit = int(min(budget + (4 << 20), max(needed * 5 // 4, 32 << 20)))

    # Advisory cost hint: 2 input + 2 output HBM streams, one exp per element.
    n_elems = total_rows * in_channels
    cost = pl.CostEstimate(
        flops=5 * n_elems,
        transcendentals=n_elems,
        bytes_accessed=sum(itemsizes) * n_elems,
    )

    attended, scores = pl.pallas_call(
        _unified_attention_kernel,
        out_shape=(
            jax.ShapeDtypeStruct((total_rows, in_channels), out_dtype),
            jax.ShapeDtypeStruct((total_rows, in_channels), scores_dtype),
        ),
        grid_spec=pltpu.PrefetchScalarGridSpec(
            num_scalar_prefetch=0,
            grid=(n_steps,),
            in_specs=[spec, spec],
            out_specs=[spec, spec],
        ),
        compiler_params=pltpu.CompilerParams(
            dimension_semantics=("parallel",),
            vmem_limit_bytes=vmem_limit,
        ),
        cost_estimate=cost,
    )(x2, w2)

    attended = attended.reshape(num_nodes, seq_len, in_channels)
    scores = scores.reshape(num_nodes, seq_len, in_channels)
    return attended, scores


def _reference(x, attn_weights):
    scores = jax.nn.softmax(attn_weights.astype(jnp.float32), axis=-1)
    return scores * x.astype(jnp.float32), scores


if __name__ == "__main__":
    # [num_nodes, seq_len, in_channels]; in_channels chosen as a lane-dense 128.
    num_nodes, seq_len, in_channels = 16, 8, 128

    key = jax.random.PRNGKey(0)
    kx, kw = jax.random.split(key)
    x = jax.random.normal(kx, (num_nodes, seq_len, in_channels), dtype=jnp.float32)
    # Deterministic stand-in for the torch.randn parameter created in forward().
    attn_weights = jax.random.normal(
        kw, (num_nodes, seq_len, in_channels), dtype=jnp.float32
    )

    ref_attended, ref_scores = _reference(x, attn_weights)

    # Default path: single full-array block (grid=(1,)) for this small shape.
    attended, scores = unified_attention_dynamic(x, attn_weights)
    attended = jax.block_until_ready(attended)
    scores = jax.block_until_ready(scores)
    assert jnp.allclose(scores, ref_scores, atol=1e-5, rtol=1e-5)
    assert jnp.allclose(attended, ref_attended, atol=1e-5, rtol=1e-5)
    assert attended.shape == x.shape and scores.shape == x.shape

    # Exercise the tiled (multi-step) path with an exactly-dividing tile.
    attended_t, scores_t = unified_attention_dynamic(x, attn_weights, tile_rows=32)
    attended_t = jax.block_until_ready(attended_t)
    scores_t = jax.block_until_ready(scores_t)
    assert jnp.allclose(scores_t, ref_scores, atol=1e-5, rtol=1e-5)
    assert jnp.allclose(attended_t, ref_attended, atol=1e-5, rtol=1e-5)

    print("KERNEL_OK")
</pallas_src>

<mosaic_0001>
module attributes {stable_mosaic.version = 11 : i64} {
  func.func @_unified_attention_kernel(%arg0: i32, %arg1: memref<128x128xf32, #tpu.memory_space<vmem>>, %arg2: memref<128x128xf32, #tpu.memory_space<vmem>>, %arg3: memref<128x128xf32, #tpu.memory_space<vmem>>, %arg4: memref<128x128xf32, #tpu.memory_space<vmem>>) attributes {dimension_semantics = [#tpu.dimension_semantics<parallel>], iteration_bounds = array<i64: 1>, scalar_prefetch = 0 : i64, scratch_operands = 0 : i64, tpu.core_type = #tpu.core_type<tc>, window_params = [{transform_indices = @transform_0, window_bounds = array<i64: 128, 128>}, {transform_indices = @transform_1, window_bounds = array<i64: 128, 128>}, {transform_indices = @transform_2, window_bounds = array<i64: 128, 128>}, {transform_indices = @transform_3, window_bounds = array<i64: 128, 128>}]} {
    %c0 = arith.constant 0 : index
    %c0_0 = arith.constant 0 : index
    %0 = vector.load %arg2[%c0, %c0_0] : memref<128x128xf32, #tpu.memory_space<vmem>>, vector<128x128xf32>
    %cst = arith.constant dense<0xFF800000> : vector<128xf32>
    %1 = vector.multi_reduction <maximumf>, %0, %cst [1] : vector<128x128xf32> to vector<128xf32>
    %2 = vector.shape_cast %1 : vector<128xf32> to vector<128x1xf32>
    %3 = vector.broadcast %2 : vector<128x1xf32> to vector<128x128xf32>
    %4 = arith.subf %0, %3 : vector<128x128xf32>
    %5 = math.exp %4 : vector<128x128xf32>
    %cst_1 = arith.constant dense<0.000000e+00> : vector<128xf32>
    %6 = vector.multi_reduction <add>, %5, %cst_1 [1] : vector<128x128xf32> to vector<128xf32>
    %7 = vector.shape_cast %6 : vector<128xf32> to vector<128x1xf32>
    %8 = vector.broadcast %7 : vector<128x1xf32> to vector<128x128xf32>
    %9 = arith.divf %5, %8 : vector<128x128xf32>
    %c0_2 = arith.constant 0 : index
    %c0_3 = arith.constant 0 : index
    %10 = vector.load %arg4[%c0_2, %c0_3] : memref<128x128xf32, #tpu.memory_space<vmem>>, vector<128x128xf32>
    tpu.vector_store %arg4[%c0_2, %c0_3], %9 {strides = array<i32>} : memref<128x128xf32, #tpu.memory_space<vmem>>, vector<128x128xf32>,
    %c0_4 = arith.constant 0 : index
    %c0_5 = arith.constant 0 : index
    %11 = vector.load %arg1[%c0_4, %c0_5] : memref<128x128xf32, #tpu.memory_space<vmem>>, vector<128x128xf32>
    %12 = arith.mulf %9, %11 : vector<128x128xf32>
    %c0_6 = arith.constant 0 : index
    %c0_7 = arith.constant 0 : index
    %13 = vector.load %arg3[%c0_6, %c0_7] : memref<128x128xf32, #tpu.memory_space<vmem>>, vector<128x128xf32>
    tpu.vector_store %arg3[%c0_6, %c0_7], %12 {strides = array<i32>} : memref<128x128xf32, #tpu.memory_space<vmem>>, vector<128x128xf32>,
    return
  }
  func.func @transform_0(%arg0: i32) -> (i32, i32) {
    %c0_i32 = arith.constant 0 : i32
    %c0_i32_0 = arith.constant 0 : i32
    return %arg0, %c0_i32 : i32, i32
  }
  func.func @transform_1(%arg0: i32) -> (i32, i32) {
    %c0_i32 = arith.constant 0 : i32
    %c0_i32_0 = arith.constant 0 : i32
    return %arg0, %c0_i32 : i32, i32
  }
  func.func @transform_2(%arg0: i32) -> (i32, i32) {
    %c0_i32 = arith.constant 0 : i32
    %c0_i32_0 = arith.constant 0 : i32
    return %arg0, %c0_i32 : i32, i32
  }
  func.func @transform_3(%arg0: i32) -> (i32, i32) {
    %c0_i32 = arith.constant 0 : i32
    %c0_i32_0 = arith.constant 0 : i32
    return %arg0, %c0_i32 : i32, i32
  }
}

</mosaic_0001>

<bundles_post_ra>
// kernel: tpu_custom_call.1
= control target key start
LH: loop header
LB: loop body
LE: loop exit
PB: predicated region body
PF: predicated region fallthrough
CT: control target
= control target key end

     0   :  { %9 = vsyncpa [#allocation3], 0  ;;  %s648_s0 = inlined_call_operand.hbm [shape: f32[128,128], index: 0, kind: input, shape index: {}]   ;;  %s649_s1 = inlined_call_operand.hbm [shape: f32[128,128], index: 1, kind: input, shape index: {}]   ;;  %s650_s2 = inlined_call_operand.hbm [shape: f32[128,128], index: 2, kind: output, shape index: {0}]   ;;  %s651_s3 = inlined_call_operand.hbm [shape: f32[128,128], index: 3, kind: output, shape index: {1}]  }
   0x1   :  { %10 = vsyncpa [#allocation6], 0 }
   0x2   :  { %11 = vsyncpa [#allocation4], 0 }
   0x3   :  { %12 = vsyncpa [#allocation9], 0  ;;  %s467_s12 = smov [#allocation2]   ;;  %s371_s16 = scalar_lea.hbm %s648_s0, 2048 }
   0x4   :  { %s18_s13 = sshll.u32 %s467_s12, 4  ;;  %p372_p0 = scmp.ne.s32.totalorder %s648_s0, %s371_s16  ;;  %s19_s13 = int_to_ptr.vmem [resolvable:$true] %s18_s13 }
   0x5   :  { %p375_p1 = scmp.lt.u32.totalorder %s371_s16, %s648_s0 }
   0x7   :  { %p377_p2 = pnand %p375_p1, %p372_p0 }
   0x9   :  { %380 = shalt.err (!%p377_p2)
}
   0xa   :  { %s381_s21 = scalar_lea.vmem %s19_s13, 2048  ;;  %p386_p4 = scmp.lt.s32.totalorder %s19_s13, %s19_s13 }
   0xb   :  { %p382_p3 = scmp.ne.s32.totalorder %s19_s13, %s381_s21  ;;  %p387_p5 = scmp.lt.s32.totalorder %s381_s21, %s381_s21 }
   0xd   :  { %p388_p6 = por %p387_p5, %p386_p4 }
   0xf   :  { %p389_p7 = pnand %p388_p6, %p382_p3 }
  0x11   :  { %392 = shalt.err (!%p389_p7)
}
  0x12   :  { %s468_s22 = smov 128   ;;  %s469_s23 = smov 8  }
  0x13   :  { %24 = dma.hbm_to_vmem [thread:$0]  %s648_s0, 2048, %s19_s13, [#allocation3], %s468_s22, %s468_s22, %s469_s23  }
  0x14   :  { %s470_s26 = smov [#allocation5]   ;;  %s393_s30 = scalar_lea.hbm %s649_s1, 2048 }
  0x15   :  { %s30_s27 = sshll.u32 %s470_s26, 4  ;;  %p394_p8 = scmp.ne.s32.totalorder %s649_s1, %s393_s30  ;;  %s31_s27 = int_to_ptr.vmem [resolvable:$true] %s30_s27 }
  0x16   :  { %p397_p9 = scmp.lt.u32.totalorder %s393_s30, %s649_s1 }
  0x18   :  { %p399_p10 = pnand %p397_p9, %p394_p8 }
  0x1a   :  { %402 = shalt.err (!%p399_p10)
}
  0x1b   :  { %s403_s8 = scalar_lea.vmem %s31_s27, 2048  ;;  %p408_p12 = scmp.lt.s32.totalorder %s31_s27, %s31_s27 }
  0x1c   :  { %p404_p11 = scmp.ne.s32.totalorder %s31_s27, %s403_s8  ;;  %p409_p13 = scmp.lt.s32.totalorder %s403_s8, %s403_s8 }
  0x1e   :  { %p410_p0 = por %p409_p13, %p408_p12 }
  0x20   :  { %p411_p1 = pnand %p410_p0, %p404_p11 }
  0x22   :  { %414 = shalt.err (!%p411_p1)
}
  0x23   :  { %36 = dma.hbm_to_vmem [thread:$0]  %s649_s1, 2048, %s31_s27, [#allocation6], %s468_s22, %s468_s22, %s469_s23  }
  0x24   :  { %459 = dma.done.wait [#allocation3], 2048  }
  0x25   :  { %460 = vsyncadd [#allocation3], 4294965248 }
  0x26   :  { %461 = dma.done.wait [#allocation6], 2048  }
  0x27   :  { %462 = vsyncadd [#allocation6], 4294965248  ;;  %v43_v0 = vld [vmem:[#allocation5] sm:$0xff]  ;;  %v45_v1 = vld [vmem:[#allocation5 + $0x10] sm:$0xff]  ;;  %s471_s1 = smov [#allocation8]   ;;  %s472_s11 = smov [#allocation7]  }
  0x28   :  { %59 = vmax.xlane.f32.xlu0 %v43_v0  ;;  %63 = vmax.xlane.f32.xlu1 %v45_v1  ;;  %v44_v2 = vld [vmem:[#allocation5 + $0x8] sm:$0xff]  ;;  %v46_v3 = vld [vmem:[#allocation5 + $0x18] sm:$0xff]  ;;  %v47_v4 = vld [vmem:[#allocation5 + $0x20] sm:$0xff]  ;;  %s284_s10 = sshll.u32 %s471_s1, 4  ;;  %s272_s12 = sshll.u32 %s472_s11, 4  ;;  %s285_s10 = int_to_ptr.vmem [resolvable:$true] %s284_s10  ;;  %s611_s12 = int_to_ptr.vmem [resolvable:$true] %s272_s12 }
  0x29   :  { %v48_v5 = vld [vmem:[#allocation5 + $0x28] sm:$0xff]  ;;  %v49_v6 = vld [vmem:[#allocation5 + $0x30] sm:$0xff]  ;;  %v50_v7 = vld [vmem:[#allocation5 + $0x38] sm:$0xff]  ;;  %s415_s13 = scalar_lea.vmem %s285_s10, 2048  ;;  %p420_p3 = scmp.lt.s32.totalorder %s285_s10, %s285_s10 }
  0x2a   :  { %v51_v8 = vld [vmem:[#allocation5 + $0x40] sm:$0xff]  ;;  %v52_v9 = vld [vmem:[#allocation5 + $0x48] sm:$0xff]  ;;  %v523_v10 = vld [vmem:[#allocation5 + $0x50] sm:$0xff]  ;;  %p416_p2 = scmp.ne.s32.totalorder %s285_s10, %s415_s13  ;;  %p421_p4 = scmp.lt.s32.totalorder %s415_s13, %s415_s13 }
  0x2b   :  { %v525_v11 = vld [vmem:[#allocation5 + $0x58] sm:$0xff]  ;;  %v529_v12 = vld [vmem:[#allocation5 + $0x60] sm:$0xff]  ;;  %v531_v13 = vld [vmem:[#allocation5 + $0x68] sm:$0xff] }
  0x2c   :  { %61 = vmax.xlane.f32.xlu0 %v44_v2  ;;  %65 = vmax.xlane.f32.xlu1 %v46_v3  ;;  %v535_v14 = vld [vmem:[#allocation5 + $0x70] sm:$0xff]  ;;  %v537_v15 = vld [vmem:[#allocation5 + $0x78] sm:$0xff]  ;;  %p422_p5 = por %p421_p4, %p420_p3 }
  0x2e   :  { %p423_p6 = pnand %p422_p5, %p416_p2 }
  0x30   :  { %67 = vmax.xlane.f32.xlu0 %v47_v4  ;;  %69 = vmax.xlane.f32.xlu1 %v48_v5 }
  0x34   :  { %71 = vmax.xlane.f32.xlu0 %v49_v6  ;;  %73 = vmax.xlane.f32.xlu1 %v50_v7 }
  0x38   :  { %75 = vmax.xlane.f32.xlu0 %v51_v8  ;;  %77 = vmax.xlane.f32.xlu1 %v52_v9 }
  0x3c   :  { %79 = vmax.xlane.f32.xlu0 %v523_v10  ;;  %81 = vmax.xlane.f32.xlu1 %v525_v11 }
  0x40   :  { %83 = vmax.xlane.f32.xlu0 %v529_v12  ;;  %85 = vmax.xlane.f32.xlu1 %v531_v13 }
  0x44   :  { %87 = vmax.xlane.f32.xlu0 %v535_v14  ;;  %89 = vmax.xlane.f32.xlu1 %v537_v15 }
  0xb5   :  { %v60_v16 = vpop.xlane.xlu0 %59  ;;  %v64_v17 = vpop.xlane.xlu1 %63 }
  0xb6   :  { %v91_v18 = vsub.f32 %v43_v0, %v60_v16  ;;  %v93_v19 = vsub.f32 %v45_v1, %v64_v17 }
  0xb8   :  { %v107_v20 = vmul.f32 1.442695, %v91_v18  ;;  %v111_v21 = vmul.f32 1.442695, %v93_v19 }
  0xb9   :  { %v62_v22 = vpop.xlane.xlu0 %61  ;;  %v66_v23 = vpop.xlane.xlu1 %65 }
  0xba   :  { %307 = vpow2.f32 %v107_v20  ;;  %v92_v24 = vsub.f32 %v44_v2, %v62_v22  ;;  %v94_v25 = vsub.f32 %v46_v3, %v66_v23  ;;  %v219_v22 = vld [vmem:[#allocation2] sm:$0xff] }
  0xbb   :  { %309 = vpow2.f32 %v111_v21 }
  0xbc   :  { %v109_v26 = vmul.f32 1.442695, %v92_v24  ;;  %v113_v27 = vmul.f32 1.442695, %v94_v25 }
  0xbd   :  { %v68_v28 = vpop.xlane.xlu0 %67  ;;  %v70_v29 = vpop.xlane.xlu1 %69 }
  0xbe   :  { %311 = vpow2.f32 %v109_v26  ;;  %v95_v30 = vsub.f32 %v47_v4, %v68_v28  ;;  %v96_v31 = vsub.f32 %v48_v5, %v70_v29  ;;  %v220_v28 = vld [vmem:[#allocation2 + $0x8] sm:$0xff] }
  0xbf   :  { %313 = vpow2.f32 %v113_v27 }
  0xc0   :  { %v115_v32 = vmul.f32 1.442695, %v95_v30  ;;  %v117_v33 = vmul.f32 1.442695, %v96_v31  ;;  %v221_v31 = vld [vmem:[#allocation2 + $0x10] sm:$0xff] }
  0xc1   :  { %v72_v34 = vpop.xlane.xlu0 %71  ;;  %v74_v35 = vpop.xlane.xlu1 %73 }
  0xc2   :  { %315 = vpow2.f32 %v115_v32  ;;  %v97_v36 = vsub.f32 %v49_v6, %v72_v34  ;;  %v98_v37 = vsub.f32 %v50_v7, %v74_v35 }
  0xc3   :  { %317 = vpow2.f32 %v117_v33 }
  0xc4   :  { %v541_v38 = vpop.eup %307  ;;  %v119_v39 = vmul.f32 1.442695, %v97_v36  ;;  %v121_v40 = vmul.f32 1.442695, %v98_v37 }
  0xc5   :  { %139 = vadd.xlane.f32.xlu0 %v541_v38  ;;  %v76_v41 = vpop.xlane.xlu0 %75  ;;  %v78_v42 = vpop.xlane.xlu1 %77 }
  0xc6   :  { %v544_v43 = vpop.eup %309  ;;  %319 = vpow2.f32 %v119_v39  ;;  %v99_v44 = vsub.f32 %v51_v8, %v76_v41  ;;  %v100_v45 = vsub.f32 %v52_v9, %v78_v42  ;;  %v223_v41 = vld [vmem:[#allocation2 + $0x20] sm:$0xff] }
  0xc7   :  { %321 = vpow2.f32 %v121_v40 }
  0xc8   :  { %v546_v46 = vpop.eup %311  ;;  %v123_v47 = vmul.f32 1.442695, %v99_v44  ;;  %v125_v48 = vmul.f32 1.442695, %v100_v45 }
  0xc9   :  { %143 = vadd.xlane.f32.xlu0 %v544_v43  ;;  %141 = vadd.xlane.f32.xlu1 %v546_v46  ;;  %v80_v49 = vpop.xlane.xlu0 %79  ;;  %v82_v50 = vpop.xlane.xlu1 %81 }
  0xca   :  { %v550_v51 = vpop.eup %313  ;;  %323 = vpow2.f32 %v123_v47  ;;  %v101_v52 = vsub.f32 %v523_v10, %v80_v49  ;;  %v102_v53 = vsub.f32 %v525_v11, %v82_v50 }
  0xcb   :  { %325 = vpow2.f32 %v125_v48  ;;  %v224_v48 = vld [vmem:[#allocation2 + $0x28] sm:$0xff] }
  0xcc   :  { %v554_v54 = vpop.eup %315  ;;  %v127_v55 = vmul.f32 1.442695, %v101_v52  ;;  %v129_v56 = vmul.f32 1.442695, %v102_v53  ;;  %v225_v52 = vld [vmem:[#allocation2 + $0x30] sm:$0xff] }
  0xcd   :  { %145 = vadd.xlane.f32.xlu1 %v550_v51  ;;  %147 = vadd.xlane.f32.xlu0 %v554_v54  ;;  %v84_v57 = vpop.xlane.xlu0 %83  ;;  %v86_v58 = vpop.xlane.xlu1 %85 }
  0xce   :  { %v558_v59 = vpop.eup %317  ;;  %327 = vpow2.f32 %v127_v55  ;;  %v103_v60 = vsub.f32 %v529_v12, %v84_v57  ;;  %v104_v61 = vsub.f32 %v531_v13, %v86_v58  ;;  %v226_v58 = vld [vmem:[#allocation2 + $0x38] sm:$0xff] }
  0xcf   :  { %329 = vpow2.f32 %v129_v56 }
  0xd0   :  { %v562_v62 = vpop.eup %319  ;;  %v131_v63 = vmul.f32 1.442695, %v103_v60  ;;  %v133_v0 = vmul.f32 1.442695, %v104_v61 }
  0xd1   :  { %149 = vadd.xlane.f32.xlu1 %v558_v59  ;;  %151 = vadd.xlane.f32.xlu0 %v562_v62  ;;  %v88_v1 = vpop.xlane.xlu0 %87  ;;  %v90_v2 = vpop.xlane.xlu1 %89 }
  0xd2   :  { %v566_v3 = vpop.eup %321  ;;  %331 = vpow2.f32 %v131_v63  ;;  %v105_v4 = vsub.f32 %v535_v14, %v88_v1  ;;  %v106_v5 = vsub.f32 %v537_v15, %v90_v2  ;;  %v227_v63 = vld [vmem:[#allocation2 + $0x40] sm:$0xff] }
  0xd3   :  { %333 = vpow2.f32 %v133_v0 }
  0xd4   :  { %v570_v6 = vpop.eup %323  ;;  %v135_v7 = vmul.f32 1.442695, %v105_v4  ;;  %v137_v8 = vmul.f32 1.442695, %v106_v5  ;;  %v228_v5 = vld [vmem:[#allocation2 + $0x48] sm:$0xff] }
  0xd5   :  { %153 = vadd.xlane.f32.xlu1 %v566_v3  ;;  %155 = vadd.xlane.f32.xlu0 %v570_v6  ;;  %v574_v9 = vpop.eup %325 }
  0xd6   :  { %335 = vpow2.f32 %v135_v7 }
  0xd7   :  { %337 = vpow2.f32 %v137_v8 }
  0xd8   :  { %v576_v10 = vpop.eup %327 }
  0xd9   :  { %157 = vadd.xlane.f32.xlu1 %v574_v9  ;;  %159 = vadd.xlane.f32.xlu0 %v576_v10  ;;  %v580_v11 = vpop.eup %329 }
  0xdc   :  { %v582_v12 = vpop.eup %331 }
  0xdd   :  { %161 = vadd.xlane.f32.xlu1 %v580_v11  ;;  %163 = vadd.xlane.f32.xlu0 %v582_v12  ;;  %v586_v13 = vpop.eup %333 }
  0xe0   :  { %v588_v14 = vpop.eup %335 }
  0xe1   :  { %165 = vadd.xlane.f32.xlu1 %v586_v13  ;;  %167 = vadd.xlane.f32.xlu0 %v588_v14  ;;  %v592_v15 = vpop.eup %337 }
  0xe5   :  { %169 = vadd.xlane.f32.xlu1 %v592_v15 }
 0x152   :  { %v140_v16 = vpop.xlane.xlu0 %139 }
 0x153   :  { %339 = vrcp.f32 %v140_v16  ;;  %v229_v16 = vld [vmem:[#allocation2 + $0x50] sm:$0xff] }
 0x156   :  { %v142_v17 = vpop.xlane.xlu1 %141  ;;  %v144_v18 = vpop.xlane.xlu0 %143 }
 0x157   :  { %341 = vrcp.f32 %v142_v17 }
 0x158   :  { %343 = vrcp.f32 %v144_v18 }
 0x15a   :  { %v146_v19 = vpop.xlane.xlu1 %145  ;;  %v148_v20 = vpop.xlane.xlu0 %147 }
 0x15b   :  { %345 = vrcp.f32 %v146_v19 }
 0x15c   :  { %347 = vrcp.f32 %v148_v20  ;;  %v230_v20 = vld [vmem:[#allocation2 + $0x58] sm:$0xff] }
 0x15d   :  { %v340_v21 = vpop.eup %339 }
 0x15e   :  { %v172_v23 = vmul.f32 %v340_v21, %v541_v38  ;;  %v150_v24 = vpop.xlane.xlu1 %149  ;;  %v152_v25 = vpop.xlane.xlu0 %151  ;;  %v222_v38 = vld [vmem:[#allocation2 + $0x18] sm:$0xff] }
 0x15f   :  { %349 = vrcp.f32 %v150_v24 }
 0x160   :  { %203 = vst [vmem:[#allocation8] sm:$0xff] %v172_v23  ;;  %v235_v26 = vmul.f32 %v219_v22, %v172_v23  ;;  %351 = vrcp.f32 %v152_v25  ;;  %v231_v23 = vld [vmem:[#allocation2 + $0x60] sm:$0xff] }
 0x161   :  { %v342_v27 = vpop.eup %341 }
 0x162   :  { %v344_v29 = vpop.eup %343  ;;  %251 = vst [vmem:[#allocation7] sm:$0xff] %v235_v26  ;;  %v174_v30 = vmul.f32 %v342_v27, %v546_v46  ;;  %v154_v32 = vpop.xlane.xlu1 %153  ;;  %v232_v26 = vld [vmem:[#allocation2 + $0x68] sm:$0xff] }
 0x163   :  { %v156_v33 = vpop.xlane.xlu0 %155  ;;  %v176_v34 = vmul.f32 %v344_v29, %v544_v43  ;;  %353 = vrcp.f32 %v154_v32  ;;  %v233_v29 = vld [vmem:[#allocation2 + $0x70] sm:$0xff]  ;;  %v234_v32 = vld [vmem:[#allocation2 + $0x78] sm:$0xff] }
 0x164   :  { %204 = vst [vmem:[#allocation8 + $0x8] sm:$0xff] %v174_v30  ;;  %v236_v35 = vmul.f32 %v220_v28, %v174_v30  ;;  %355 = vrcp.f32 %v156_v33 }
 0x165   :  { %v346_v36 = vpop.eup %345  ;;  %205 = vst [vmem:[#allocation8 + $0x10] sm:$0xff] %v176_v34  ;;  %v237_v37 = vmul.f32 %v221_v31, %v176_v34 }
 0x166   :  { %v348_v39 = vpop.eup %347  ;;  %252 = vst [vmem:[#allocation7 + $0x8] sm:$0xff] %v236_v35  ;;  %v178_v40 = vmul.f32 %v346_v36, %v550_v51  ;;  %v158_v42 = vpop.xlane.xlu1 %157 }
 0x167   :  { %v160_v44 = vpop.xlane.xlu0 %159  ;;  %253 = vst [vmem:[#allocation7 + $0x10] sm:$0xff] %v237_v37  ;;  %v180_v45 = vmul.f32 %v348_v39, %v554_v54  ;;  %357 = vrcp.f32 %v158_v42 }
 0x168   :  { %206 = vst [vmem:[#allocation8 + $0x18] sm:$0xff] %v178_v40  ;;  %v238_v43 = vmul.f32 %v222_v38, %v178_v40  ;;  %359 = vrcp.f32 %v160_v44 }
 0x169   :  { %v350_v46 = vpop.eup %349  ;;  %207 = vst [vmem:[#allocation8 + $0x20] sm:$0xff] %v180_v45  ;;  %v239_v47 = vmul.f32 %v223_v41, %v180_v45 }
 0x16a   :  { %v352_v49 = vpop.eup %351  ;;  %254 = vst [vmem:[#allocation7 + $0x18] sm:$0xff] %v238_v43  ;;  %v182_v50 = vmul.f32 %v350_v46, %v558_v59  ;;  %v162_v51 = vpop.xlane.xlu1 %161 }
 0x16b   :  { %v164_v53 = vpop.xlane.xlu0 %163  ;;  %255 = vst [vmem:[#allocation7 + $0x20] sm:$0xff] %v239_v47  ;;  %v184_v55 = vmul.f32 %v352_v49, %v562_v62  ;;  %361 = vrcp.f32 %v162_v51 }
 0x16c   :  { %208 = vst [vmem:[#allocation8 + $0x28] sm:$0xff] %v182_v50  ;;  %v240_v54 = vmul.f32 %v224_v48, %v182_v50  ;;  %363 = vrcp.f32 %v164_v53 }
 0x16d   :  { %v354_v56 = vpop.eup %353  ;;  %209 = vst [vmem:[#allocation8 + $0x30] sm:$0xff] %v184_v55  ;;  %v241_v57 = vmul.f32 %v225_v52, %v184_v55 }
 0x16e   :  { %v356_v60 = vpop.eup %355  ;;  %256 = vst [vmem:[#allocation7 + $0x28] sm:$0xff] %v240_v54  ;;  %v186_v61 = vmul.f32 %v354_v56, %v566_v3  ;;  %v166_v59 = vpop.xlane.xlu1 %165 }
 0x16f   :  { %v168_v0 = vpop.xlane.xlu0 %167  ;;  %257 = vst [vmem:[#allocation7 + $0x30] sm:$0xff] %v241_v57  ;;  %v188_v1 = vmul.f32 %v356_v60, %v570_v6  ;;  %365 = vrcp.f32 %v166_v59 }
 0x170   :  { %210 = vst [vmem:[#allocation8 + $0x38] sm:$0xff] %v186_v61  ;;  %v242_v62 = vmul.f32 %v226_v58, %v186_v61  ;;  %367 = vrcp.f32 %v168_v0 }
 0x171   :  { %v358_v2 = vpop.eup %357  ;;  %211 = vst [vmem:[#allocation8 + $0x40] sm:$0xff] %v188_v1  ;;  %v243_v4 = vmul.f32 %v227_v63, %v188_v1 }
 0x172   :  { %v360_v7 = vpop.eup %359  ;;  %258 = vst [vmem:[#allocation7 + $0x38] sm:$0xff] %v242_v62  ;;  %v190_v8 = vmul.f32 %v358_v2, %v574_v9  ;;  %v170_v3 = vpop.xlane.xlu1 %169 }
 0x173   :  { %259 = vst [vmem:[#allocation7 + $0x40] sm:$0xff] %v243_v4  ;;  %v192_v17 = vmul.f32 %v360_v7, %v576_v10  ;;  %369 = vrcp.f32 %v170_v3 }
 0x174   :  { %212 = vst [vmem:[#allocation8 + $0x48] sm:$0xff] %v190_v8  ;;  %v244_v6 = vmul.f32 %v228_v5, %v190_v8 }
 0x175   :  { %v362_v18 = vpop.eup %361  ;;  %213 = vst [vmem:[#allocation8 + $0x50] sm:$0xff] %v192_v17  ;;  %v245_v19 = vmul.f32 %v229_v16, %v192_v17 }
 0x176   :  { %v364_v21 = vpop.eup %363  ;;  %260 = vst [vmem:[#allocation7 + $0x48] sm:$0xff] %v244_v6  ;;  %v194_v22 = vmul.f32 %v362_v18, %v580_v11 }
 0x177   :  { %261 = vst [vmem:[#allocation7 + $0x50] sm:$0xff] %v245_v19  ;;  %v196_v9 = vmul.f32 %v364_v21, %v582_v12 }
 0x178   :  { %214 = vst [vmem:[#allocation8 + $0x58] sm:$0xff] %v194_v22  ;;  %v246_v24 = vmul.f32 %v230_v20, %v194_v22 }
 0x179   :  { %v366_v25 = vpop.eup %365  ;;  %215 = vst [vmem:[#allocation8 + $0x60] sm:$0xff] %v196_v9  ;;  %v247_v10 = vmul.f32 %v231_v23, %v196_v9 }
 0x17a   :  { %v368_v27 = vpop.eup %367  ;;  %262 = vst [vmem:[#allocation7 + $0x58] sm:$0xff] %v246_v24  ;;  %v198_v28 = vmul.f32 %v366_v25, %v586_v13 }
 0x17b   :  { %263 = vst [vmem:[#allocation7 + $0x60] sm:$0xff] %v247_v10  ;;  %v200_v30 = vmul.f32 %v368_v27, %v588_v14 }
 0x17c   :  { %216 = vst [vmem:[#allocation8 + $0x68] sm:$0xff] %v198_v28  ;;  %v248_v11 = vmul.f32 %v232_v26, %v198_v28 }
 0x17d   :  { %v370_v31 = vpop.eup %369  ;;  %217 = vst [vmem:[#allocation8 + $0x70] sm:$0xff] %v200_v30  ;;  %v249_v12 = vmul.f32 %v233_v29, %v200_v30 }
 0x17e   :  { %264 = vst [vmem:[#allocation7 + $0x68] sm:$0xff] %v248_v11  ;;  %v202_v33 = vmul.f32 %v370_v31, %v592_v15 }
 0x17f   :  { %265 = vst [vmem:[#allocation7 + $0x70] sm:$0xff] %v249_v12 }
 0x180   :  { %218 = vst [vmem:[#allocation8 + $0x78] sm:$0xff] %v202_v33  ;;  %v250_v13 = vmul.f32 %v234_v32, %v202_v33 }
 0x181   :  { %426 = shalt.err (!%p423_p6)
}
 0x182   :  { %s427_s16 = scalar_lea.hbm %s651_s3, 2048 }
 0x183   :  { %p428_p7 = scmp.ne.s32.totalorder %s651_s3, %s427_s16  ;;  %p431_p8 = scmp.lt.u32.totalorder %s427_s16, %s651_s3 }
 0x185   :  { %p433_p9 = pnand %p431_p8, %p428_p7 }
 0x187   :  { %436 = shalt.err (!%p433_p9)
}
 0x188   :  { %290 = dma.vmem_to_hbm [thread:$0]  %s285_s10, 2048, %s651_s3, [#allocation9], %s468_s22, %s468_s22, %s469_s23   ;;  %266 = vst [vmem:[#allocation7 + $0x78] sm:$0xff] %v250_v13 }
 0x189   :  { %s437_s25 = scalar_lea.vmem %s611_s12, 2048  ;;  %p442_p11 = scmp.lt.s32.totalorder %s611_s12, %s611_s12 }
 0x18a   :  { %p438_p10 = scmp.ne.s32.totalorder %s611_s12, %s437_s25  ;;  %p443_p12 = scmp.lt.s32.totalorder %s437_s25, %s437_s25 }
 0x18c   :  { %p444_p13 = por %p443_p12, %p442_p11 }
 0x18e   :  { %p445_p0 = pnand %p444_p13, %p438_p10 }
 0x190   :  { %448 = shalt.err (!%p445_p0)
}
 0x191   :  { %s449_s28 = scalar_lea.hbm %s650_s2, 2048 }
 0x192   :  { %p450_p1 = scmp.ne.s32.totalorder %s650_s2, %s449_s28  ;;  %p453_p2 = scmp.lt.u32.totalorder %s449_s28, %s650_s2 }
 0x194   :  { %p455_p3 = pnand %p453_p2, %p450_p1 }
 0x196   :  { %458 = shalt.err (!%p455_p3)
}
 0x197   :  { %278 = dma.vmem_to_hbm [thread:$0]  %s611_s12, 2048, %s650_s2, [#allocation4], %s468_s22, %s468_s22, %s469_s23  }
 0x198   :  { %463 = dma.done.wait [#allocation4], 2048  }
 0x199   :  { %464 = vsyncadd [#allocation4], 4294965248 }
 0x19a   :  { %465 = dma.done.wait [#allocation9], 2048  }
 0x19b   :  { %466 = vsyncadd [#allocation9], 4294965248 }
 0x19c   :  { %297 = vsyncpa [#allocation3], 1 }
 0x19d   :  { %298 = vsyncpa [#allocation6], 1 }
 0x19e   :  { %299 = vsyncpa [#allocation4], 1 }
 0x19f   :  { %300 = vsyncpa [#allocation9], 1 }

</bundles_post_ra>
